<compile_context>
chip_gen: v5e
topology: v5e:2x2
jax: 0.10.0
libtpu: 0.0.40
codegen_flags: <defaults>
</compile_context>

<pallas_src>
import jax
import jax.numpy as jnp
from jax.experimental import pallas as pl
from jax.experimental.pallas import tpu as pltpu


def _round_up(x: int, m: int) -> int:
    return (x + m - 1) // m * m


def _pick_tm(batch: int) -> int:
    """Batch tile: prefer >=128 when the batch allows, else minimize padding.

    Always a multiple of 16 (bf16 packs 16 sublanes per vreg)."""
    cands = (512, 256, 128) if batch >= 128 else (128, 64, 32, 16)
    best_t, best_pad = None, None
    for t in cands:  # largest first; strict '<' keeps larger tile on ties
        mp = _round_up(batch, t)
        if best_pad is None or mp < best_pad:
            best_t, best_pad = t, mp
    return best_t


def _pick_tk(k_pad: int, tm: int, nn: int,
             budget_bytes: int = 20 * 1024 * 1024) -> int:
    """Largest divisor of k_pad (multiple of 128) whose double-buffered tile
    footprint fits a conservative VMEM budget (safe on v5e/v6e/v7x)."""
    steps = k_pad // 128
    for d in range(steps, 0, -1):
        if steps % d:
            continue
        tk = d * 128
        fp = (2 * tm * tk * 2       # x tile, bf16, double-buffered
              + 2 * tk * nn * 2     # weight tile, bf16, double-buffered
              + 2 * tm * nn * 4     # f32 output tile, double-buffered
              + 2 * nn * 4)         # bias
        if fp <= budget_bytes:
            return tk
    return 128


# --------------------------------------------------------------------------
# Kernels
# --------------------------------------------------------------------------
def _fused_kernel(temp_ref, x_ref, w_ref, b_ref, o_ref):
    """Single-K-block path: one MXU matmul + bias + 1/T, no branches/scratch.

    temp_ref: SMEM (1,)      f32  -- learnable temperature
    x_ref:    VMEM (tm, K)   bf16 -- flattened-input tile
    w_ref:    VMEM (K, nn)   bf16 -- weight tile
    b_ref:    VMEM (1, nn)   f32  -- bias (lane-padded, zero-filled)
    o_ref:    VMEM (tm, nn)  f32  -- temperature-scaled logits tile
    """
    acc = jnp.dot(x_ref[...], w_ref[...], preferred_element_type=jnp.float32)
    inv_t = 1.0 / temp_ref[0]
    o_ref[...] = (acc + b_ref[...]) * inv_t


def _accum_kernel(temp_ref, x_ref, w_ref, b_ref, o_ref):
    """Multi-K-block path: accumulate directly into the resident f32 output
    tile (its block index is constant across the innermost k axis)."""
    k = pl.program_id(2)
    partial = jnp.dot(x_ref[...], w_ref[...],
                      preferred_element_type=jnp.float32)

    @pl.when(k == 0)
    def _():
        o_ref[...] = partial

    @pl.when(k > 0)
    def _():
        o_ref[...] += partial

    @pl.when(k == pl.num_programs(2) - 1)
    def _():
        inv_t = 1.0 / temp_ref[0]
        o_ref[...] = (o_ref[...] + b_ref[...]) * inv_t


# --------------------------------------------------------------------------
# One-time parameter preparation ("model init"): pad + cast the static head.
# --------------------------------------------------------------------------
def prepare_model_with_temperature(weight, bias, temperature):
    """weight: (K, N) with K = C*H*W  (a torch nn.Linear checkpoint stored as
    (N, K) must be transposed before calling).  bias: (N,).  temperature: (1,).
    """
    K, N = weight.shape
    assert bias.shape == (N,), "bias must have shape (num_classes,)"
    K_pad = _round_up(K, 128)
    N_pad = _round_up(N, 128)   # lane-dense output: no masked stores

    w_p = jnp.pad(weight.astype(jnp.bfloat16),
                  ((0, K_pad - K), (0, N_pad - N)))
    b_p = jnp.pad(bias.astype(jnp.float32), (0, N_pad - N)).reshape(1, N_pad)
    temp = jnp.asarray(temperature, jnp.float32).reshape(1)

    return {"w": w_p, "b": b_p, "t": temp, "K": K, "N": N}


# --------------------------------------------------------------------------
# Forward: logits = Linear(flatten(x)) / temperature (fused Pallas kernel)
# --------------------------------------------------------------------------
def model_with_temperature_forward(x_nchw, params):
    w_p, b_p, temp = params["w"], params["b"], params["t"]
    K, N = params["K"], params["N"]
    K_pad, N_pad = w_p.shape
    B = x_nchw.shape[0]

    x2d = x_nchw.reshape(B, -1)           # torch .view(B, -1) order
    assert x2d.shape[1] == K, (
        f"flattened input dim {x2d.shape[1]} != weight K dim {K}")

    # ---- tile sizes --------------------------------------------------------
    tm = _pick_tm(B)
    M_pad = _round_up(B, tm)
    nn = min(N_pad, 256)                  # N chunks -> v7x 2-TC parallelism
    tk = _pick_tk(K_pad, tm, nn)

    nm, njn, nk = M_pad // tm, N_pad // nn, K_pad // tk

    # ---- per-call activation prep (only the activations move per call) -----
    x_bf = x2d.astype(jnp.bfloat16)
    if M_pad != B or K_pad != K:
        x_bf = jnp.pad(x_bf, ((0, M_pad - B), (0, K_pad - K)))

    cost = pl.CostEstimate(
        flops=2 * M_pad * K_pad * N_pad,
        transcendentals=0,
        bytes_accessed=(M_pad * K_pad * 2 * njn     # x re-streamed per N tile
                        + K_pad * N_pad * 2 * nm    # weight re-streamed per M tile
                        + N_pad * 4 * nm * njn      # bias
                        + M_pad * N_pad * 4),       # output writeback
    )

    temp_spec = pl.BlockSpec(memory_space=pltpu.SMEM)

    if nk == 1:
        # K fits VMEM: collapse the reduction axis entirely.
        grid = (nm, njn)
        grid_spec = pltpu.PrefetchScalarGridSpec(
            num_scalar_prefetch=0,
            grid=grid,
            in_specs=[
                temp_spec,
                pl.BlockSpec((tm, K_pad), lambda i, j: (i, 0)),   # x
                pl.BlockSpec((K_pad, nn), lambda i, j: (0, j)),   # weight
                pl.BlockSpec((1, nn), lambda i, j: (0, j)),       # bias
            ],
            out_specs=pl.BlockSpec((tm, nn), lambda i, j: (i, j)),
        )
        kernel = _fused_kernel
        dim_sem = ("parallel", "parallel")
    else:
        grid = (nm, njn, nk)
        grid_spec = pltpu.PrefetchScalarGridSpec(
            num_scalar_prefetch=0,
            grid=grid,
            in_specs=[
                temp_spec,
                pl.BlockSpec((tm, tk), lambda i, j, k: (i, k)),   # x
                pl.BlockSpec((tk, nn), lambda i, j, k: (k, j)),   # weight
                pl.BlockSpec((1, nn), lambda i, j, k: (0, j)),    # bias
            ],
            out_specs=pl.BlockSpec((tm, nn), lambda i, j, k: (i, j)),
        )
        kernel = _accum_kernel
        dim_sem = ("parallel", "parallel", "arbitrary")

    out = pl.pallas_call(
        kernel,
        out_shape=jax.ShapeDtypeStruct((M_pad, N_pad), jnp.float32),
        grid_spec=grid_spec,
        compiler_params=pltpu.CompilerParams(
            dimension_semantics=dim_sem,
            vmem_limit_bytes=32 * 1024 * 1024,
        ),
        cost_estimate=cost,
    )(temp, x_bf, w_p, b_p)

    # Slice away padded batch rows / classes so no garbage leaks downstream.
    return out[:B, :N]


if __name__ == "__main__":
    key = jax.random.PRNGKey(0)
    kx, kw, kb = jax.random.split(key, 3)

    # Small shapes: batch=2, channels=4, spatial=16x16, num_classes=10
    B, C, H, W = 2, 4, 16, 16
    num_classes = 10
    K = C * H * W

    x = jax.random.normal(kx, (B, C, H, W), dtype=jnp.float32)
    # Deterministic synthetic base-model parameters (not a checkpoint load).
    # TODO(synk): the wrapped `model` is arbitrary in PyTorch; only a linear
    # classifier head is materialized here.
    weight = jax.random.normal(kw, (K, num_classes), dtype=jnp.float32) * 0.02
    bias = jax.random.normal(kb, (num_classes,), dtype=jnp.float32) * 0.1
    # nn.Parameter(torch.ones(1) * 1.0)
    temperature = jnp.ones((1,), dtype=jnp.float32) * 1.0

    # One-time init: pad + bf16-cast the static head (hoisted out of forward).
    params = prepare_model_with_temperature(weight, bias, temperature)

    out = model_with_temperature_forward(x, params)
    out = jax.block_until_ready(out)

    # Pure-JAX reference (same bf16 inputs, f32 accumulation).
    x_bf = x.reshape(B, K).astype(jnp.bfloat16)
    w_bf = weight.astype(jnp.bfloat16)
    ref = (jnp.dot(x_bf, w_bf, preferred_element_type=jnp.float32) + bias) / temperature

    assert out.shape == (B, num_classes)
    err = jnp.max(jnp.abs(out - ref))
    assert jnp.allclose(out, ref, atol=1e-2, rtol=1e-2), f"max abs err {err}"

    print("KERNEL_OK")
</pallas_src>

<mosaic_0001>
module attributes {stable_mosaic.version = 11 : i64} {
  func.func @_fused_kernel(%arg0: i32, %arg1: i32, %arg2: memref<1xf32, #tpu.memory_space<smem>>, %arg3: memref<16x1024xbf16, #tpu.memory_space<vmem>>, %arg4: memref<1024x128xbf16, #tpu.memory_space<vmem>>, %arg5: memref<1x128xf32, #tpu.memory_space<vmem>>, %arg6: memref<16x128xf32, #tpu.memory_space<vmem>>) attributes {dimension_semantics = [#tpu.dimension_semantics<parallel>, #tpu.dimension_semantics<parallel>], iteration_bounds = array<i64: 1, 1>, scalar_prefetch = 0 : i64, scratch_operands = 0 : i64, tpu.core_type = #tpu.core_type<tc>, window_params = [{transform_indices = @transform_0, window_bounds = array<i64: 1>}, {transform_indices = @transform_1, window_bounds = array<i64: 16, 1024>}, {transform_indices = @transform_2, window_bounds = array<i64: 1024, 128>}, {transform_indices = @transform_3, window_bounds = array<i64: 1, 128>}, {transform_indices = @transform_4, window_bounds = array<i64: 16, 128>}]} {
    %c0 = arith.constant 0 : index
    %c0_0 = arith.constant 0 : index
    %0 = vector.load %arg3[%c0, %c0_0] : memref<16x1024xbf16, #tpu.memory_space<vmem>>, vector<16x1024xbf16>
    %c0_1 = arith.constant 0 : index
    %c0_2 = arith.constant 0 : index
    %1 = vector.load %arg4[%c0_1, %c0_2] : memref<1024x128xbf16, #tpu.memory_space<vmem>>, vector<1024x128xbf16>
    %cst = arith.constant dense<0.000000e+00> : vector<16x128xf32>
    %2 = tpu.matmul %0, %1, %cst {dimension_numbers = #tpu.dot_dimension_numbers<[1], [0], [0], [1], [0, 0, 1, 1], [], []>} : vector<16x1024xbf16>, vector<1024x128xbf16>, vector<16x128xf32> -> vector<16x128xf32>
    %c0_3 = arith.constant 0 : index
    %3 = memref.load %arg2[%c0_3] : memref<1xf32, #tpu.memory_space<smem>>
    %cst_4 = arith.constant 1.000000e+00 : f32
    %4 = arith.divf %cst_4, %3 : f32
    %c0_5 = arith.constant 0 : index
    %c0_6 = arith.constant 0 : index
    %5 = vector.load %arg5[%c0_5, %c0_6] : memref<1x128xf32, #tpu.memory_space<vmem>>, vector<1x128xf32>
    %6 = vector.broadcast %5 : vector<1x128xf32> to vector<16x128xf32>
    %7 = arith.addf %2, %6 : vector<16x128xf32>
    %8 = vector.broadcast %4 : f32 to vector<16x128xf32>
    %9 = arith.mulf %7, %8 : vector<16x128xf32>
    %c0_7 = arith.constant 0 : index
    %c0_8 = arith.constant 0 : index
    %10 = vector.load %arg6[%c0_7, %c0_8] : memref<16x128xf32, #tpu.memory_space<vmem>>, vector<16x128xf32>
    tpu.vector_store %arg6[%c0_7, %c0_8], %9 {strides = array<i32>} : memref<16x128xf32, #tpu.memory_space<vmem>>, vector<16x128xf32>,
    return
  }
  func.func @transform_0(%arg0: i32, %arg1: i32) -> i32 {
    %c0_i32 = arith.constant 0 : i32
    %c0_i32_0 = arith.constant 0 : i32
    return %c0_i32 : i32
  }
  func.func @transform_1(%arg0: i32, %arg1: i32) -> (i32, i32) {
    %c0_i32 = arith.constant 0 : i32
    %c0_i32_0 = arith.constant 0 : i32
    return %arg0, %c0_i32 : i32, i32
  }
  func.func @transform_2(%arg0: i32, %arg1: i32) -> (i32, i32) {
    %c0_i32 = arith.constant 0 : i32
    %c0_i32_0 = arith.constant 0 : i32
    return %c0_i32, %arg1 : i32, i32
  }
  func.func @transform_3(%arg0: i32, %arg1: i32) -> (i32, i32) {
    %c0_i32 = arith.constant 0 : i32
    %c0_i32_0 = arith.constant 0 : i32
    return %c0_i32, %arg1 : i32, i32
  }
  func.func @transform_4(%arg0: i32, %arg1: i32) -> (i32, i32) {
    %c0_i32 = arith.constant 0 : i32
    return %arg0, %arg1 : i32, i32
  }
}

</mosaic_0001>

<bundles_post_ra>
// kernel: tpu_custom_call.1
= control target key start
LH: loop header
LB: loop body
LE: loop exit
PB: predicated region body
PF: predicated region fallthrough
CT: control target
= control target key end

     0   :  { %10 = vsyncpa [#allocation4], 0  ;;  %s1270_s0 = inlined_call_operand.<no memory space> [shape: f32[1], index: 0, kind: input, shape index: {}]   ;;  %s1271_s1 = inlined_call_operand.hbm [shape: bf16[16,1024], index: 1, kind: input, shape index: {}]   ;;  %s1272_s2 = inlined_call_operand.hbm [shape: bf16[1024,128], index: 2, kind: input, shape index: {}]   ;;  %s1273_s3 = inlined_call_operand.vmem [shape: f32[1,128], index: 3, kind: input, shape index: {}]   ;;  %s1274_s4 = inlined_call_operand.hbm [shape: f32[16,128], index: 4, kind: output, shape index: {}]  }
   0x1   :  { %11 = vsyncpa [#allocation7], 0 }
   0x2   :  { %12 = vsyncpa [#allocation5], 0  ;;  %s19_s17 = sshll.u32 %s1271_s1, 4  ;;  %s1221_s18 = smov [#allocation3]   ;;  %s20_s17 = int_to_ptr.hbm [resolvable:$true] %s19_s17 }
   0x3   :  { %s21_s19 = sshll.u32 %s1221_s18, 4  ;;  %s32_s22 = sshll.u32 %s1272_s2, 4  ;;  %s22_s19 = int_to_ptr.vmem [resolvable:$true] %s21_s19  ;;  %s33_s22 = int_to_ptr.hbm [resolvable:$true] %s32_s22 }
   0x4   :  { %s1222_s23 = smov 512   ;;  %s1223_s24 = smov 32  }
   0x5   :  { %27 = dma.hbm_to_vmem [thread:$0]  %s20_s17, 1024, %s22_s19, [#allocation4], %s1222_s23, %s1222_s23, %s1223_s24  }
   0x6   :  { %s1224_s25 = smov [#allocation6]   ;;  %s1225_s27 = smov 64  }
   0x7   :  { %s34_s26 = sshll.u32 %s1224_s25, 4  ;;  %s1226_s28 = smov 4   ;;  %s35_s26 = int_to_ptr.vmem [resolvable:$true] %s34_s26 }
   0x8   :  { %40 = dma.hbm_to_vmem [thread:$0]  %s33_s22, 8192, %s35_s26, [#allocation7], %s1225_s27, %s1225_s27, %s1226_s28  }
   0x9   :  { %1215 = dma.done.wait [#allocation4], 1024  }
   0xa   :  { %1216 = vsyncadd [#allocation4], 4294966272 }
   0xb   :  { %1217 = dma.done.wait [#allocation7], 8192  }
   0xc   :  { %1218 = vsyncadd [#allocation7], 4294959104  ;;  %v1072_v0 = vld [vmem:[#allocation6 + $0x38] sm:$0xff]  ;;  %v1071_v4 = vld [vmem:[#allocation6 + $0x30] sm:$0xff]  ;;  %v188_v50 = vstv %s1270_s0  ;;  %s755_s8 = sshll.u32 %s1274_s4, 4  ;;  %s1228_s9 = smov 128   ;;  %s756_s8 = int_to_ptr.hbm [resolvable:$true] %s755_s8 }
   0xd   :  { %v1080_v1 = vld [vmem:[#allocation6 + $0x78] sm:$0xff]  ;;  %632 = vmatpush.bf16.msra.mxu0 %v1072_v0  ;;  %v1079_v5 = vld [vmem:[#allocation6 + $0x70] sm:$0xff]  ;;  %v1070_v8 = vld [vmem:[#allocation6 + $0x28] sm:$0xff]  ;;  %1141 = vrcp.f32 %v188_v50  ;;  %v200_v63 = vand.u32 2147483648, %v188_v50  ;;  %vm194_vm0 = vweird.f32 %v188_v50  ;;  %s1229_s10 = smov 8  }
   0xe   :  { %v1088_v2 = vld [vmem:[#allocation6 + $0xb8] sm:$0xff]  ;;  %646 = vmatpush.bf16.msra.mxu1 %v1080_v1  ;;  %v1087_v6 = vld [vmem:[#allocation6 + $0xb0] sm:$0xff]  ;;  %v1078_v9 = vld [vmem:[#allocation6 + $0x68] sm:$0xff]  ;;  %v198_v1 = vand.u32 2147483647, %v188_v50 }
   0xf   :  { %v1096_v3 = vld [vmem:[#allocation6 + $0xf8] sm:$0xff]  ;;  %660 = vmatpush.bf16.msra.mxu2 %v1088_v2  ;;  %v1095_v7 = vld [vmem:[#allocation6 + $0xf0] sm:$0xff]  ;;  %v1086_v10 = vld [vmem:[#allocation6 + $0xa8] sm:$0xff] }
  0x10   :  { %674 = vmatpush.bf16.msra.mxu3 %v1096_v3  ;;  %v1094_v11 = vld [vmem:[#allocation6 + $0xe8] sm:$0xff]  ;;  %v1069_v12 = vld [vmem:[#allocation6 + $0x20] sm:$0xff]  ;;  %v1068_v16 = vld [vmem:[#allocation6 + $0x18] sm:$0xff]  ;;  %vm199_vm3 = vcmp.eq.f32.partialorder %v198_v1, 8.507059e+37 }
  0x11   :  { %633 = vmatpush.bf16.msra.mxu0 %v1071_v4  ;;  %v1077_v13 = vld [vmem:[#allocation6 + $0x60] sm:$0xff]  ;;  %v1076_v17 = vld [vmem:[#allocation6 + $0x58] sm:$0xff]  ;;  %v1067_v20 = vld [vmem:[#allocation6 + $0x10] sm:$0xff] }
  0x12   :  { %647 = vmatpush.bf16.msra.mxu1 %v1079_v5  ;;  %v1085_v14 = vld [vmem:[#allocation6 + $0xa0] sm:$0xff]  ;;  %v1084_v18 = vld [vmem:[#allocation6 + $0x98] sm:$0xff]  ;;  %v1075_v21 = vld [vmem:[#allocation6 + $0x50] sm:$0xff] }
  0x13   :  { %661 = vmatpush.bf16.msra.mxu2 %v1087_v6  ;;  %v1093_v15 = vld [vmem:[#allocation6 + $0xe0] sm:$0xff]  ;;  %v1092_v19 = vld [vmem:[#allocation6 + $0xd8] sm:$0xff]  ;;  %v1083_v22 = vld [vmem:[#allocation6 + $0x90] sm:$0xff]  ;;  %v1142_v57 = vpop.eup %1141 }
  0x14   :  { %675 = vmatpush.bf16.msra.mxu3 %v1095_v7  ;;  %v1091_v23 = vld [vmem:[#allocation6 + $0xd0] sm:$0xff]  ;;  %v1066_v24 = vld [vmem:[#allocation6 + $0x8] sm:$0xff]  ;;  %v1065_v28 = vld [vmem:[#allocation6] sm:$0xff]  ;;  %v190_v60 = vmul.f32 %v1142_v57, %v188_v50  ;;  %vm195_vm1 = vweird.f32 %v1142_v57  ;;  %v201_v7 = vor.u32 1.1754944e-38, %v200_v63 }
  0x15   :  { %634 = vmatpush.bf16.msra.mxu0 %v1070_v8  ;;  %v1074_v25 = vld [vmem:[#allocation6 + $0x48] sm:$0xff]  ;;  %v1073_v29 = vld [vmem:[#allocation6 + $0x40] sm:$0xff]  ;;  %v1104_v32 = vld [vmem:[#allocation6 + $0x138] sm:$0xff] }
  0x16   :  { %648 = vmatpush.bf16.msra.mxu1 %v1078_v9  ;;  %v1082_v26 = vld [vmem:[#allocation6 + $0x88] sm:$0xff]  ;;  %v1081_v30 = vld [vmem:[#allocation6 + $0x80] sm:$0xff]  ;;  %v1112_v33 = vld [vmem:[#allocation6 + $0x178] sm:$0xff]  ;;  %v191_v0 = vsub.f32 1.0, %v190_v60 }
  0x17   :  { %662 = vmatpush.bf16.msra.mxu2 %v1086_v10  ;;  %v1090_v27 = vld [vmem:[#allocation6 + $0xc8] sm:$0xff]  ;;  %v1089_v31 = vld [vmem:[#allocation6 + $0xc0] sm:$0xff]  ;;  %v1120_v42 = vld [vmem:[#allocation6 + $0x1b8] sm:$0xff] }
  0x18   :  { %676 = vmatpush.bf16.msra.mxu3 %v1094_v11  ;;  %v779_v34 = vld [vmem:[#allocation3 + $0x8] sm:$0xf]  ;;  %v771_v36 = vld [vmem:[#allocation3] sm:$0xf]  ;;  %v1058_v38 = vld [vmem:[#allocation3 + $0xc] sm:$0xf]  ;;  %v192_v4 = vmul.f32 %v1142_v57, %v191_v0 }
  0x19   :  { %635 = vmatpush.bf16.msra.mxu0 %v1069_v12  ;;  %v1062_v35 = vld [vmem:[#allocation3 + $0x24] sm:$0xf0]  ;;  %v1061_v37 = vld [vmem:[#allocation3 + $0x1c] sm:$0xf0]  ;;  %v781_v39 = vld [vmem:[#allocation3 + $0x28] sm:$0xf0] }
  0x1a   :  { %649 = vmatpush.bf16.msra.mxu1 %v1077_v13  ;;  %v1057_v40 = vld [vmem:[#allocation3 + $0x4] sm:$0xf]  ;;  %v1128_v43 = vld [vmem:[#allocation6 + $0x1f8] sm:$0xff]  ;;  %v780_v44 = vor.u32 %v1062_v35, %v779_v34  ;;  %v772_v45 = vor.u32 %v1061_v37, %v771_v36  ;;  %v784_v46 = vor.u32 %v1058_v38, %v781_v39  ;;  %v1103_v48 = vld [vmem:[#allocation6 + $0x130] sm:$0xff]  ;;  %v193_v8 = vadd.f32 %v1142_v57, %v192_v4 }
  0x1b   :  { %663 = vmatpush.bf16.msra.mxu2 %v1085_v14  ;;  %v773_v41 = vld [vmem:[#allocation3 + $0x20] sm:$0xf0]  ;;  %v1111_v49 = vld [vmem:[#allocation6 + $0x170] sm:$0xff]  ;;  %v1102_v53 = vld [vmem:[#allocation6 + $0x128] sm:$0xff] }
  0x1c   :  { %677 = vmatpush.bf16.msra.mxu3 %v1093_v15  ;;  %v776_v47 = vor.u32 %v1057_v40, %v773_v41  ;;  %v1119_v51 = vld [vmem:[#allocation6 + $0x1b0] sm:$0xff]  ;;  %v1110_v54 = vld [vmem:[#allocation6 + $0x168] sm:$0xff]  ;;  %v1101_v58 = vld [vmem:[#allocation6 + $0x120] sm:$0xff] }
  0x1d   :  { %636 = vmatpush.bf16.msra.mxu0 %v1068_v16  ;;  %v1127_v52 = vld [vmem:[#allocation6 + $0x1f0] sm:$0xff]  ;;  %v1118_v55 = vld [vmem:[#allocation6 + $0x1a8] sm:$0xff]  ;;  %v1109_v59 = vld [vmem:[#allocation6 + $0x160] sm:$0xff] }
  0x1e   :  { %650 = vmatpush.bf16.msra.mxu1 %v1076_v17  ;;  %v1126_v56 = vld [vmem:[#allocation6 + $0x1e8] sm:$0xff]  ;;  %v1117_v61 = vld [vmem:[#allocation6 + $0x1a0] sm:$0xff]  ;;  %v1100_v2 = vld [vmem:[#allocation6 + $0x118] sm:$0xff] }
  0x1f   :  { %664 = vmatpush.bf16.msra.mxu2 %v1084_v18  ;;  %v1125_v62 = vld [vmem:[#allocation6 + $0x1e0] sm:$0xff]  ;;  %v1108_v3 = vld [vmem:[#allocation6 + $0x158] sm:$0xff]  ;;  %vm196_vm2 = vmor %vm194_vm0, %vm195_vm1 }
  0x20   :  { %678 = vmatpush.bf16.msra.mxu3 %v1092_v19  ;;  %v1116_v5 = vld [vmem:[#allocation6 + $0x198] sm:$0xff]  ;;  %v1099_v9 = vld [vmem:[#allocation6 + $0x110] sm:$0xff]  ;;  %v197_v11 = vsel %vm196_vm2, %v1142_v57, %v193_v8  ;;  %v1098_v15 = vld [vmem:[#allocation6 + $0x108] sm:$0xff] }
  0x21   :  { %637 = vmatpush.bf16.msra.mxu0 %v1067_v20  ;;  %v1124_v6 = vld [vmem:[#allocation6 + $0x1d8] sm:$0xff]  ;;  %v1107_v10 = vld [vmem:[#allocation6 + $0x150] sm:$0xff]  ;;  %v202_v14 = vsel %vm199_vm3, %v201_v7, %v197_v11  ;;  %v1106_v16 = vld [vmem:[#allocation6 + $0x148] sm:$0xff] }
  0x22   :  { %651 = vmatpush.bf16.msra.mxu1 %v1075_v21  ;;  %v1115_v12 = vld [vmem:[#allocation6 + $0x190] sm:$0xff]  ;;  %1129 = vpush %v202_v14  ;;  %v1114_v17 = vld [vmem:[#allocation6 + $0x188] sm:$0xff]  ;;  %v1097_v19 = vld [vmem:[#allocation6 + $0x100] sm:$0xff] }
  0x23   :  { %665 = vmatpush.bf16.msra.mxu2 %v1083_v22  ;;  %v1123_v13 = vld [vmem:[#allocation6 + $0x1d0] sm:$0xff]  ;;  %v1122_v18 = vld [vmem:[#allocation6 + $0x1c8] sm:$0xff]  ;;  %v1105_v20 = vld [vmem:[#allocation6 + $0x140] sm:$0xff] }
  0x24   :  { %679 = vmatpush.bf16.msra.mxu3 %v1091_v23  ;;  %v1113_v21 = vld [vmem:[#allocation6 + $0x180] sm:$0xff]  ;;  %v787_v23 = vld [vmem:[#allocation3 + $0x10] sm:$0xf] }
  0x25   :  { %638 = vmatpush.bf16.msra.mxu0 %v1066_v24  ;;  %v1121_v22 = vld [vmem:[#allocation6 + $0x1c0] sm:$0xff]  ;;  %v1063_v24 = vld [vmem:[#allocation3 + $0x2c] sm:$0xf0] }
  0x26   :  { %652 = vmatpush.bf16.msra.mxu1 %v1074_v25  ;;  %v1059_v25 = vld [vmem:[#allocation3 + $0x14] sm:$0xf]  ;;  %v1140_v36 = vld [vmem:[%s1273_s3] ss:$0 sm:$0xff]  ;;  %s1227_s3 = smov [#allocation8]  }
  0x27   :  { %666 = vmatpush.bf16.msra.mxu2 %v1082_v26  ;;  %v789_v26 = vld [vmem:[#allocation3 + $0x30] sm:$0xf0]  ;;  %s753_s5 = sshll.u32 %s1227_s3, 4  ;;  %s754_s5 = int_to_ptr.vmem [resolvable:$true] %s753_s5 }
  0x28   :  { %680 = vmatpush.bf16.msra.mxu3 %v1090_v27  ;;  %v795_v27 = vld [vmem:[#allocation3 + $0x18] sm:$0xf] }
  0x29   :  { %639 = vmatpush.bf16.msra.mxu0 %v1065_v28  ;;  %v1064_v28 = vld [vmem:[#allocation3 + $0x34] sm:$0xf0] }
  0x2a   :  { %653 = vmatpush.bf16.msra.mxu1 %v1073_v29  ;;  %v1060_v29 = vld [vmem:[#allocation3 + $0x1c] sm:$0xf] }
  0x2b   :  { %667 = vmatpush.bf16.msra.mxu2 %v1081_v30  ;;  %v797_v30 = vld [vmem:[#allocation3 + $0x38] sm:$0xf0] }
  0x2c   :  { %681 = vmatpush.bf16.msra.mxu3 %v1089_v31  ;;  %640 = vmatmul.bf16.vlgmr.msra.gmra.mxu0 %v772_v45  ;;  %v788_v31 = vor.u32 %v1063_v24, %v787_v23  ;;  %v800_v34 = vor.u32 %v1060_v29, %v797_v30 }
  0x2d   :  { %688 = vmatpush.bf16.msrb.mxu0 %v1104_v32  ;;  %654 = vmatmul.bf16.vlgmr.msra.gmra.mxu1 %v776_v47  ;;  %v792_v32 = vor.u32 %v1059_v25, %v789_v26 }
  0x2e   :  { %702 = vmatpush.bf16.msrb.mxu1 %v1112_v33  ;;  %668 = vmatmul.bf16.vlgmr.msra.gmra.mxu2 %v780_v44  ;;  %v796_v33 = vor.u32 %v1064_v28, %v795_v27 }
  0x2f   :  { %716 = vmatpush.bf16.msrb.mxu2 %v1120_v42  ;;  %682 = vmatmul.bf16.vlgmr.msra.gmra.mxu3 %v784_v46 }
  0x30   :  { %730 = vmatpush.bf16.msrb.mxu3 %v1128_v43 }
  0x31   :  { %689 = vmatpush.bf16.msrb.mxu0 %v1103_v48 }
  0x32   :  { %703 = vmatpush.bf16.msrb.mxu1 %v1111_v49 }
  0x33   :  { %717 = vmatpush.bf16.msrb.mxu2 %v1119_v51 }
  0x34   :  { %731 = vmatpush.bf16.msrb.mxu3 %v1127_v52 }
  0x35   :  { %690 = vmatpush.bf16.msrb.mxu0 %v1102_v53 }
  0x36   :  { %704 = vmatpush.bf16.msrb.mxu1 %v1110_v54 }
  0x37   :  { %718 = vmatpush.bf16.msrb.mxu2 %v1118_v55 }
  0x38   :  { %732 = vmatpush.bf16.msrb.mxu3 %v1126_v56 }
  0x39   :  { %691 = vmatpush.bf16.msrb.mxu0 %v1101_v58 }
  0x3a   :  { %705 = vmatpush.bf16.msrb.mxu1 %v1109_v59 }
  0x3b   :  { %719 = vmatpush.bf16.msrb.mxu2 %v1117_v61 }
  0x3c   :  { %733 = vmatpush.bf16.msrb.mxu3 %v1125_v62 }
  0x3d   :  { %692 = vmatpush.bf16.msrb.mxu0 %v1100_v2 }
  0x3e   :  { %706 = vmatpush.bf16.msrb.mxu1 %v1108_v3 }
  0x3f   :  { %720 = vmatpush.bf16.msrb.mxu2 %v1116_v5 }
  0x40   :  { %734 = vmatpush.bf16.msrb.mxu3 %v1124_v6 }
  0x41   :  { %693 = vmatpush.bf16.msrb.mxu0 %v1099_v9 }
  0x42   :  { %707 = vmatpush.bf16.msrb.mxu1 %v1107_v10 }
  0x43   :  { %721 = vmatpush.bf16.msrb.mxu2 %v1115_v12 }
  0x44   :  { %735 = vmatpush.bf16.msrb.mxu3 %v1123_v13 }
  0x45   :  { %694 = vmatpush.bf16.msrb.mxu0 %v1098_v15 }
  0x46   :  { %708 = vmatpush.bf16.msrb.mxu1 %v1106_v16 }
  0x47   :  { %722 = vmatpush.bf16.msrb.mxu2 %v1114_v17 }
  0x48   :  { %736 = vmatpush.bf16.msrb.mxu3 %v1122_v18 }
  0x49   :  { %695 = vmatpush.bf16.msrb.mxu0 %v1097_v19 }
  0x4a   :  { %709 = vmatpush.bf16.msrb.mxu1 %v1105_v20 }
  0x4b   :  { %723 = vmatpush.bf16.msrb.mxu2 %v1113_v21 }
  0x4c   :  { %737 = vmatpush.bf16.msrb.mxu3 %v1121_v22  ;;  %696 = vmatmul.bf16.vlgmr.msrb.gmra.mxu0 %v788_v31 }
  0x4d   :  { %710 = vmatmul.bf16.vlgmr.msrb.gmra.mxu1 %v792_v32 }
  0x4e   :  { %724 = vmatmul.bf16.vlgmr.msrb.gmra.mxu2 %v796_v33 }
  0x4f   :  { %738 = vmatmul.bf16.vlgmr.msrb.gmra.mxu3 %v800_v34 }
  0x53   :  { %s1130_s30 = spop %1129 }
  0x54   :  { %v744_v60 = vstv %s1130_s30 }
  0xa9   :  { %v641_v35 = vpop.f32.mrf.mxu0 }
  0xaa   :  { %v655_v37 = vpop.f32.mrf.mxu1  ;;  %v642_v38 = vadd.f32 %v1140_v36, %v641_v35 }
  0xac   :  { %v656_v41 = vadd.f32 %v655_v37, %v642_v38 }
  0xb1   :  { %v669_v39 = vpop.f32.mrf.mxu2  ;;  %v643_v42 = vpop.f32.mrf.mxu0 }
  0xb2   :  { %v683_v40 = vpop.f32.mrf.mxu3  ;;  %v657_v43 = vpop.f32.mrf.mxu1  ;;  %v670_v44 = vadd.f32 %v669_v39, %v656_v41  ;;  %v644_v45 = vadd.f32 %v1140_v36, %v643_v42 }
  0xb4   :  { %v684_v48 = vadd.f32 %v683_v40, %v670_v44  ;;  %v658_v49 = vadd.f32 %v657_v43, %v644_v45 }
  0xb9   :  { %v671_v46 = vpop.f32.mrf.mxu2 }
  0xba   :  { %v685_v47 = vpop.f32.mrf.mxu3  ;;  %v672_v53 = vadd.f32 %v671_v46, %v658_v49 }
  0xbc   :  { %v686_v57 = vadd.f32 %v685_v47, %v672_v53 }
  0xc9   :  { %v697_v50 = vpop.f32.mrf.mxu0 }
  0xca   :  { %v698_v51 = vadd.f32 %v697_v50, %v684_v48  ;;  %v711_v52 = vpop.f32.mrf.mxu1 }
  0xcc   :  { %v712_v54 = vadd.f32 %v711_v52, %v698_v51 }
  0xd1   :  { %v725_v55 = vpop.f32.mrf.mxu2  ;;  %v699_v59 = vpop.f32.mrf.mxu0 }
  0xd2   :  { %v739_v56 = vpop.f32.mrf.mxu3  ;;  %v726_v58 = vadd.f32 %v725_v55, %v712_v54  ;;  %v700_v62 = vadd.f32 %v699_v59, %v686_v57  ;;  %v713_v0 = vpop.f32.mrf.mxu1 }
  0xd4   :  { %v740_v61 = vadd.f32 %v739_v56, %v726_v58  ;;  %v714_v1 = vadd.f32 %v713_v0, %v700_v62 }
  0xd6   :  { %v745_v63 = vmul.f32 %v744_v60, %v740_v61 }
  0xd8   :  { %747 = vst [vmem:[#allocation8] sm:$0xff] %v745_v63 }
  0xd9   :  { %v727_v2 = vpop.f32.mrf.mxu2 }
  0xda   :  { %v728_v3 = vadd.f32 %v727_v2, %v714_v1  ;;  %v741_v4 = vpop.f32.mrf.mxu3 }
  0xdc   :  { %v742_v5 = vadd.f32 %v741_v4, %v728_v3 }
  0xde   :  { %v746_v6 = vmul.f32 %v744_v60, %v742_v5 }
  0xe0   :  { %748 = vst [vmem:[#allocation8 + $0x8] sm:$0xff] %v746_v6 }
  0xe1   :  { %761 = dma.vmem_to_hbm [thread:$0]  %s754_s5, 256, %s756_s8, [#allocation5], %s1228_s9, %s1228_s9, %s1229_s10  }
  0xe2   :  { %1219 = dma.done.wait [#allocation5], 256  }
  0xe3   :  { %1220 = vsyncadd [#allocation5], 4294967040 }
  0xe4   :  { %766 = vsyncpa [#allocation4], 1 }
  0xe5   :  { %767 = vsyncpa [#allocation7], 1 }
  0xe6   :  { %768 = vsyncpa [#allocation5], 1 }

</bundles_post_ra>
